<compile_context>
chip_gen: v5e
topology: v5e:2x2
jax: 0.10.0
libtpu: 0.0.40
codegen_flags: <defaults>
</compile_context>

<pallas_src>
import functools

import jax
import jax.numpy as jnp
from jax.experimental import pallas as pl
from jax.experimental.pallas import tpu as pltpu


def _round_up(n: int, m: int) -> int:
    return (n + m - 1) // m * m


def _vmem_capacity_bytes() -> int:
    """Per-core VMEM capacity; conservative 64 MiB (v7x, smallest) if unknown."""
    try:
        cap = int(getattr(pltpu.get_tpu_info(), "vmem_capacity_bytes", 0))
        if cap > 0:
            return cap
    except Exception:  # hardware query unavailable -> size for the smallest VMEM
        pass
    return 64 * 1024 * 1024


@functools.lru_cache(maxsize=None)
def _single_buffer_supported() -> bool:
    """Capability probe: constant-index BlockSpec with pipeline_mode=pl.Buffered(1).

    Compiles a trivial kernel once per process instead of wrapping the real
    pallas_call in a broad try/except (which would hide genuine lowering bugs
    and silently double the weight VMEM footprint).  If unsupported, the
    resident plan budgets for default double-buffered weights.
    """
    if not hasattr(pl, "Buffered"):
        return False

    def _copy(x_ref, o_ref):
        o_ref[...] = x_ref[...]

    try:
        spec = pl.BlockSpec((8, 128), lambda i: (0, 0), pipeline_mode=pl.Buffered(1))
        fn = pl.pallas_call(
            _copy,
            out_shape=jax.ShapeDtypeStruct((8, 128), jnp.float32),
            grid=(1,),
            in_specs=[spec],
            out_specs=pl.BlockSpec((8, 128), lambda i: (0, 0)))
        jax.jit(fn).lower(jax.ShapeDtypeStruct((8, 128), jnp.float32)).compile()
        return True
    except Exception:
        return False


# ----------------------------------------------------------------------------
# Kernels
# ----------------------------------------------------------------------------
def _ffn_resident_kernel(x_ref, w1_ref, b1_ref, w2_ref, b2_ref, o_ref):
    # x_ref : (tm, dm_p)    activation tile (compute dtype)
    # w1_ref: (dm_p, dh_p)  ; b1_ref: (1, dh_p) f32
    # w2_ref: (dh_p, dm_p)  ; b2_ref: (1, dm_p) f32
    # o_ref : (tm, dm_p)    output dtype
    h = jnp.dot(x_ref[...], w1_ref[...], preferred_element_type=jnp.float32)
    h = jnp.maximum(h + b1_ref[...], 0.0)                    # bias + ReLU in f32
    y = jnp.dot(h.astype(w2_ref.dtype), w2_ref[...],
                preferred_element_type=jnp.float32)
    o_ref[...] = (y + b2_ref[...]).astype(o_ref.dtype)


def _ffn_ktiled_kernel(x_ref, w1_ref, b1_ref, w2_ref, b2_ref, o_ref, acc_ref):
    # Streams the hidden axis: w1 column-chunk (dm_p, tk), w2 row-chunk (tk, dm_p).
    # ReLU is elementwise over hidden, so per-chunk relu + accumulate is exact.
    k = pl.program_id(1)

    @pl.when(k == 0)
    def _init():
        acc_ref[...] = jnp.zeros_like(acc_ref)

    h = jnp.dot(x_ref[...], w1_ref[...], preferred_element_type=jnp.float32)
    h = jnp.maximum(h + b1_ref[...], 0.0)
    acc_ref[...] += jnp.dot(h.astype(w2_ref.dtype), w2_ref[...],
                            preferred_element_type=jnp.float32)

    @pl.when(k == pl.num_programs(1) - 1)
    def _finalize():
        o_ref[...] = (acc_ref[...] + b2_ref[...]).astype(o_ref.dtype)


# ----------------------------------------------------------------------------
# pallas_call builders
# ----------------------------------------------------------------------------
def _const_spec(shape, n_grid_axes):
    """Constant-index spec: single pipeline buffer when supported (halves VMEM)."""
    idx = (lambda i: (0, 0)) if n_grid_axes == 1 else (lambda i, k: (0, 0))
    if _single_buffer_supported():
        return pl.BlockSpec(shape, idx, pipeline_mode=pl.Buffered(1))
    return pl.BlockSpec(shape, idx)


def _build_resident_call(M_p, dm_p, dh_p, tm, out_dtype, cost, vmem_limit):
    grid_spec = pltpu.PrefetchScalarGridSpec(
        num_scalar_prefetch=0,
        grid=(M_p // tm,),
        in_specs=[
            pl.BlockSpec((tm, dm_p), lambda i: (i, 0)),   # x tile (double-buffered)
            _const_spec((dm_p, dh_p), 1),                 # w1 (VMEM-resident)
            _const_spec((1, dh_p), 1),                    # b1
            _const_spec((dh_p, dm_p), 1),                 # w2 (VMEM-resident)
            _const_spec((1, dm_p), 1),                    # b2
        ],
        out_specs=pl.BlockSpec((tm, dm_p), lambda i: (i, 0)),
    )
    return pl.pallas_call(
        _ffn_resident_kernel,
        out_shape=jax.ShapeDtypeStruct((M_p, dm_p), out_dtype),
        grid_spec=grid_spec,
        compiler_params=pltpu.CompilerParams(
            dimension_semantics=("parallel",),            # row tiles shard across TCs
            vmem_limit_bytes=vmem_limit),
        cost_estimate=cost,
    )


def _build_ktiled_call(M_p, dm_p, dh_p, tm, tk, out_dtype, cost, vmem_limit):
    grid_spec = pltpu.PrefetchScalarGridSpec(
        num_scalar_prefetch=0,
        grid=(M_p // tm, dh_p // tk),                     # reduction axis last
        in_specs=[
            pl.BlockSpec((tm, dm_p), lambda i, k: (i, 0)),  # x tile, resident over k
            pl.BlockSpec((dm_p, tk), lambda i, k: (0, k)),  # w1 column-chunk (streamed)
            pl.BlockSpec((1, tk),    lambda i, k: (0, k)),  # b1 chunk
            pl.BlockSpec((tk, dm_p), lambda i, k: (k, 0)),  # w2 row-chunk (streamed)
            _const_spec((1, dm_p), 2),                      # b2 (resident)
        ],
        out_specs=pl.BlockSpec((tm, dm_p), lambda i, k: (i, 0)),  # resident over k
        scratch_shapes=[pltpu.VMEM((tm, dm_p), jnp.float32)],     # f32 accumulator
    )
    return pl.pallas_call(
        _ffn_ktiled_kernel,
        out_shape=jax.ShapeDtypeStruct((M_p, dm_p), out_dtype),
        grid_spec=grid_spec,
        compiler_params=pltpu.CompilerParams(
            dimension_semantics=("parallel", "arbitrary"),
            vmem_limit_bytes=vmem_limit),
        cost_estimate=cost,
    )


# ----------------------------------------------------------------------------
# VMEM footprint models / tile selection
# ----------------------------------------------------------------------------
def _resident_footprint(tm, dm_p, dh_p, csz, osz):
    wbuf = 1 if _single_buffer_supported() else 2         # weight pipeline buffers
    return (2 * tm * dm_p * (csz + osz)                   # x in + y out, double-buffered
            + wbuf * 2 * dm_p * dh_p * csz                # w1 + w2
            + wbuf * 4 * (dh_p + dm_p)                    # biases (f32)
            + tm * dh_p * (4 + csz))                      # hidden f32 + compute-dtype cast


def _ktiled_footprint(tm, tk, dm_p, csz, osz):
    return (2 * tm * dm_p * (csz + osz)                   # x in + y out, double-buffered
            + 2 * 2 * dm_p * tk * csz                     # w1/w2 chunks, double-buffered
            + 2 * 4 * tk + 4 * dm_p                       # biases (f32)
            + tm * dm_p * 4                               # f32 accumulator scratch
            + tm * tk * (4 + csz))                        # hidden chunk f32 + cast


def _choose_row_tile(M, tm_req):
    tm = min(_round_up(tm_req, 16), _round_up(M, 16))     # bf16 packs 2 rows/sublane
    # Guarantee >=2 row tiles when there is enough work so v7x's 2nd TC is used.
    if M > 16 and _round_up(M, tm) // tm < 2:
        tm = _round_up(-(-M // 2), 16)
    return tm, _round_up(M, tm)


# ----------------------------------------------------------------------------
# Public wrapper
# ----------------------------------------------------------------------------
def feed_forward_network(x, w1, b1, w2, b2, *, tm=None, tk=None,
                         compute_dtype=jnp.bfloat16, out_dtype=None,
                         weights_resident=None):
    """FFN forward: relu(x @ w1 + b1) @ w2 + b2  (dropout = identity / eval mode).

    x: [B, S, d_model]; w1: [d_model, d_hidden]; w2: [d_hidden, d_model]
    (weights are the transpose of nn.Linear.weight).  Matmuls run in
    `compute_dtype` on the MXU with f32 accumulation; output dtype defaults to
    x.dtype (pass out_dtype=jnp.bfloat16 to halve output VMEM/HBM traffic).
    `weights_resident` forces the resident / k-tiled plan (None = auto).
    """
    B, S, d_model = x.shape
    d_hidden = w1.shape[1]
    M = B * S

    cdt = jnp.dtype(compute_dtype)
    odt = jnp.dtype(x.dtype if out_dtype is None else out_dtype)
    csz, osz = cdt.itemsize, odt.itemsize

    dm_p = _round_up(d_model, 128)                        # lane-dense feature axis
    # Hidden axis: 256-aligned (v6e/v7x MXUs are 2x256^2) when padding waste <= ~6%.
    dh_p = _round_up(d_hidden, 256)
    if (dh_p - d_hidden) * 16 > d_hidden:
        dh_p = _round_up(d_hidden, 128)

    # Per-generation VMEM budget with headroom for Mosaic-internal scratch.
    vmem_cap = _vmem_capacity_bytes()
    budget = max(16 * 1024 * 1024, vmem_cap - 8 * 1024 * 1024)

    # Row tile: 512 on big-VMEM chips with plenty of rows (amortizes per-step
    # overhead, good for v5e/v6e), else 256 (keeps the tm x dh_p f32 hidden
    # intermediate small enough for v7x's 64 MiB VMEM).
    if tm is None:
        tm = 512 if (vmem_cap >= 96 * 1024 * 1024 and M >= 512) else 256
    tm_eff, M_p = _choose_row_tile(M, tm)

    # Plan selection: keep weights resident whenever they fit (each weight read
    # from HBM exactly once). Shrinking the row tile is cheaper than streaming
    # weights (which re-reads them M_p/tm times), so try that first.
    use_resident = weights_resident
    if use_resident is None:
        use_resident = _resident_footprint(tm_eff, dm_p, dh_p, csz, osz) <= budget
        if not use_resident:
            for t in (256, 128):
                if t < tm_eff:
                    tm_try, M_try = _choose_row_tile(M, t)
                    if _resident_footprint(tm_try, dm_p, dh_p, csz, osz) <= budget:
                        tm_eff, M_p, use_resident = tm_try, M_try, True
                        break

    if not use_resident:
        # Hidden-axis chunk size: largest 256-multiple whose working set fits.
        if tk is None:
            tk = 256
            for cand in (4096, 2048, 1024, 512, 256):
                if _ktiled_footprint(tm_eff, cand, dm_p, csz, osz) <= budget:
                    tk = cand
                    break
        tk = min(_round_up(tk, 128), _round_up(d_hidden, 128))
        dh_p = _round_up(d_hidden, tk)
        # Note: extreme d_model would additionally need output-feature tiling;
        # not required for transformer FFN widths.

    # Padding / cast.  No-op pads and casts are skipped, so aligned inputs and
    # pre-padded / pre-cast (compute-dtype) weights pass through with zero extra
    # wrapper-side HBM traffic (recommended for steady-state inference).
    # Zero-padded feature/hidden columns contribute 0 to both matmuls; padded
    # rows produce relu(b1) @ w2 + b2 but are sliced off below.
    def _prep(a, shape, dtype):
        pads = tuple((0, p - s) for s, p in zip(a.shape, shape))
        if any(p != (0, 0) for p in pads):
            a = jnp.pad(a, pads)
        return a if a.dtype == dtype else a.astype(dtype)

    x2 = _prep(x.reshape(M, d_model), (M_p, dm_p), cdt)
    w1p = _prep(w1, (dm_p, dh_p), cdt)
    w2p = _prep(w2, (dh_p, dm_p), cdt)
    b1p = _prep(b1.reshape(1, d_hidden), (1, dh_p), jnp.float32)
    b2p = _prep(b2.reshape(1, d_model), (1, dm_p), jnp.float32)

    # Advisory cost so XLA schedules neighbouring ops around the custom call.
    flops = 4 * M_p * dm_p * dh_p                         # two matmuls, 2*M*K*N each
    bytes_accessed = (M_p * dm_p * (csz + osz)            # x in, y out
                      + 2 * dm_p * dh_p * csz             # w1 + w2 (read once)
                      + 4 * (dh_p + dm_p))                # biases
    if not use_resident:
        bytes_accessed += (M_p // tm_eff - 1) * 2 * dm_p * dh_p * csz  # weight re-reads
    cost = pl.CostEstimate(flops=flops, transcendentals=0,
                           bytes_accessed=bytes_accessed)

    fp = (_resident_footprint(tm_eff, dm_p, dh_p, csz, osz) if use_resident
          else _ktiled_footprint(tm_eff, tk, dm_p, csz, osz))
    # Clamp the scoped-VMEM request to device capacity (v7x has only 64 MiB/TC).
    vmem_limit = int(min(vmem_cap - 4 * 1024 * 1024,
                         max(32 * 1024 * 1024, fp * 5 // 4)))

    if use_resident:
        call = _build_resident_call(M_p, dm_p, dh_p, tm_eff, odt, cost, vmem_limit)
    else:
        call = _build_ktiled_call(M_p, dm_p, dh_p, tm_eff, tk, odt, cost, vmem_limit)

    out2 = call(x2, w1p, b1p, w2p, b2p)
    return out2[:M, :d_model].reshape(B, S, d_model)


def init_params(key, d_model, d_hidden, dtype=jnp.float32):
    """Deterministic synthetic params; shapes match nn.Linear (stored transposed)."""
    k1, k2, k3, k4 = jax.random.split(key, 4)
    lim1 = 1.0 / (d_model ** 0.5)
    lim2 = 1.0 / (d_hidden ** 0.5)
    w1 = jax.random.uniform(k1, (d_model, d_hidden), dtype, -lim1, lim1)
    b1 = jax.random.uniform(k2, (d_hidden,), dtype, -lim1, lim1)
    w2 = jax.random.uniform(k3, (d_hidden, d_model), dtype, -lim2, lim2)
    b2 = jax.random.uniform(k4, (d_model,), dtype, -lim2, lim2)
    return w1, b1, w2, b2


if __name__ == "__main__":
    key = jax.random.PRNGKey(0)
    kx, kp, kx2, kp2 = jax.random.split(key, 4)

    # --- small base shape --------------------------------------------------
    B, S, d_model, d_hidden = 2, 8, 32, 64
    x = jax.random.normal(kx, (B, S, d_model), jnp.float32)
    w1, b1, w2, b2 = init_params(kp, d_model, d_hidden)
    ref = jnp.maximum(x @ w1 + b1, 0.0) @ w2 + b2

    # 1) f32 compute path (resident-weight plan): tight tolerance.
    out_f32 = jax.block_until_ready(
        feed_forward_network(x, w1, b1, w2, b2, compute_dtype=jnp.float32))
    assert out_f32.shape == x.shape
    assert jnp.allclose(out_f32, ref, atol=1e-5, rtol=1e-5)

    # 2) Default bf16 MXU path (f32 accumulation): looser tolerance for bf16 rounding.
    out_bf16 = jax.block_until_ready(feed_forward_network(x, w1, b1, w2, b2))
    assert out_bf16.shape == x.shape
    assert jnp.allclose(out_bf16, ref, atol=5e-2, rtol=5e-2)

    # 3) K-tiled (streamed-weight) plan, forced, with >1 hidden chunk and >1 row
    #    tile; f32 compute for a tight tolerance check of the accumulator path.
    B2, S2, dm2, dh2 = 2, 128, 128, 512
    x2 = jax.random.normal(kx2, (B2, S2, dm2), jnp.float32)
    p2 = init_params(kp2, dm2, dh2)
    ref2 = jnp.maximum(x2 @ p2[0] + p2[1], 0.0) @ p2[2] + p2[3]
    out_kt = jax.block_until_ready(
        feed_forward_network(x2, *p2, compute_dtype=jnp.float32,
                             weights_resident=False, tk=256, tm=128))
    assert out_kt.shape == x2.shape
    assert jnp.allclose(out_kt, ref2, atol=1e-4, rtol=1e-4)

    print("KERNEL_OK")
</pallas_src>

<mosaic_0001>
module attributes {stable_mosaic.version = 11 : i64} {
  func.func @_ffn_resident_kernel(%arg0: i32, %arg1: memref<16x128xf32, #tpu.memory_space<vmem>>, %arg2: memref<128x128xf32, #tpu.memory_space<vmem>>, %arg3: memref<1x128xf32, #tpu.memory_space<vmem>>, %arg4: memref<128x128xf32, #tpu.memory_space<vmem>>, %arg5: memref<1x128xf32, #tpu.memory_space<vmem>>, %arg6: memref<16x128xf32, #tpu.memory_space<vmem>>) attributes {dimension_semantics = [#tpu.dimension_semantics<parallel>], iteration_bounds = array<i64: 1>, scalar_prefetch = 0 : i64, scratch_operands = 0 : i64, tpu.core_type = #tpu.core_type<tc>, window_params = [{transform_indices = @transform_0, window_bounds = array<i64: 16, 128>}, {pipeline_mode = #tpu.pipeline_mode<synchronous>, transform_indices = @transform_1, window_bounds = array<i64: 128, 128>}, {pipeline_mode = #tpu.pipeline_mode<synchronous>, transform_indices = @transform_2, window_bounds = array<i64: 1, 128>}, {pipeline_mode = #tpu.pipeline_mode<synchronous>, transform_indices = @transform_3, window_bounds = array<i64: 128, 128>}, {pipeline_mode = #tpu.pipeline_mode<synchronous>, transform_indices = @transform_4, window_bounds = array<i64: 1, 128>}, {transform_indices = @transform_5, window_bounds = array<i64: 16, 128>}]} {
    %c0 = arith.constant 0 : index
    %c0_0 = arith.constant 0 : index
    %0 = vector.load %arg1[%c0, %c0_0] : memref<16x128xf32, #tpu.memory_space<vmem>>, vector<16x128xf32>
    %c0_1 = arith.constant 0 : index
    %c0_2 = arith.constant 0 : index
    %1 = vector.load %arg2[%c0_1, %c0_2] : memref<128x128xf32, #tpu.memory_space<vmem>>, vector<128x128xf32>
    %cst = arith.constant dense<0.000000e+00> : vector<16x128xf32>
    %2 = tpu.matmul %0, %1, %cst {dimension_numbers = #tpu.dot_dimension_numbers<[1], [0], [0], [1], [0, 0, 1, 1], [], []>} : vector<16x128xf32>, vector<128x128xf32>, vector<16x128xf32> -> vector<16x128xf32>
    %c0_3 = arith.constant 0 : index
    %c0_4 = arith.constant 0 : index
    %3 = vector.load %arg3[%c0_3, %c0_4] : memref<1x128xf32, #tpu.memory_space<vmem>>, vector<1x128xf32>
    %4 = vector.broadcast %3 : vector<1x128xf32> to vector<16x128xf32>
    %5 = arith.addf %2, %4 : vector<16x128xf32>
    %cst_5 = arith.constant 0.000000e+00 : f32
    %6 = vector.broadcast %cst_5 : f32 to vector<16x128xf32>
    %7 = arith.maximumf %5, %6 : vector<16x128xf32>
    %c0_6 = arith.constant 0 : index
    %c0_7 = arith.constant 0 : index
    %8 = vector.load %arg4[%c0_6, %c0_7] : memref<128x128xf32, #tpu.memory_space<vmem>>, vector<128x128xf32>
    %cst_8 = arith.constant dense<0.000000e+00> : vector<16x128xf32>
    %9 = tpu.matmul %7, %8, %cst_8 {dimension_numbers = #tpu.dot_dimension_numbers<[1], [0], [0], [1], [0, 0, 1, 1], [], []>} : vector<16x128xf32>, vector<128x128xf32>, vector<16x128xf32> -> vector<16x128xf32>
    %c0_9 = arith.constant 0 : index
    %c0_10 = arith.constant 0 : index
    %10 = vector.load %arg5[%c0_9, %c0_10] : memref<1x128xf32, #tpu.memory_space<vmem>>, vector<1x128xf32>
    %11 = vector.broadcast %10 : vector<1x128xf32> to vector<16x128xf32>
    %12 = arith.addf %9, %11 : vector<16x128xf32>
    %c0_11 = arith.constant 0 : index
    %c0_12 = arith.constant 0 : index
    %13 = vector.load %arg6[%c0_11, %c0_12] : memref<16x128xf32, #tpu.memory_space<vmem>>, vector<16x128xf32>
    tpu.vector_store %arg6[%c0_11, %c0_12], %12 {strides = array<i32>} : memref<16x128xf32, #tpu.memory_space<vmem>>, vector<16x128xf32>,
    return
  }
  func.func @transform_0(%arg0: i32) -> (i32, i32) {
    %c0_i32 = arith.constant 0 : i32
    %c0_i32_0 = arith.constant 0 : i32
    return %arg0, %c0_i32 : i32, i32
  }
  func.func @transform_1(%arg0: i32) -> (i32, i32) {
    %c0_i32 = arith.constant 0 : i32
    %c0_i32_0 = arith.constant 0 : i32
    %c0_i32_1 = arith.constant 0 : i32
    return %c0_i32, %c0_i32_0 : i32, i32
  }
  func.func @transform_2(%arg0: i32) -> (i32, i32) {
    %c0_i32 = arith.constant 0 : i32
    %c0_i32_0 = arith.constant 0 : i32
    %c0_i32_1 = arith.constant 0 : i32
    return %c0_i32, %c0_i32_0 : i32, i32
  }
  func.func @transform_3(%arg0: i32) -> (i32, i32) {
    %c0_i32 = arith.constant 0 : i32
    %c0_i32_0 = arith.constant 0 : i32
    %c0_i32_1 = arith.constant 0 : i32
    return %c0_i32, %c0_i32_0 : i32, i32
  }
  func.func @transform_4(%arg0: i32) -> (i32, i32) {
    %c0_i32 = arith.constant 0 : i32
    %c0_i32_0 = arith.constant 0 : i32
    %c0_i32_1 = arith.constant 0 : i32
    return %c0_i32, %c0_i32_0 : i32, i32
  }
  func.func @transform_5(%arg0: i32) -> (i32, i32) {
    %c0_i32 = arith.constant 0 : i32
    %c0_i32_0 = arith.constant 0 : i32
    return %arg0, %c0_i32 : i32, i32
  }
}

</mosaic_0001>

<bundles_post_ra>
// kernel: tpu_custom_call.1
= control target key start
LH: loop header
LB: loop body
LE: loop exit
PB: predicated region body
PF: predicated region fallthrough
CT: control target
= control target key end

     0   :  { %10 = vsyncpa [#allocation3], 0  ;;  %s388_s0 = inlined_call_operand.hbm [shape: f32[16,128], index: 0, kind: input, shape index: {}]   ;;  %s389_s1 = inlined_call_operand.hbm [shape: f32[128,128], index: 1, kind: input, shape index: {}]   ;;  %s390_s2 = inlined_call_operand.vmem [shape: f32[1,128], index: 2, kind: input, shape index: {}]   ;;  %s391_s3 = inlined_call_operand.hbm [shape: f32[128,128], index: 3, kind: input, shape index: {}]   ;;  %s392_s4 = inlined_call_operand.vmem [shape: f32[1,128], index: 4, kind: input, shape index: {}]   ;;  %s393_s5 = inlined_call_operand.hbm [shape: f32[16,128], index: 5, kind: output, shape index: {}]  }
   0x1   :  { %11 = vsyncpa [#allocation6], 0 }
   0x2   :  { %12 = vsyncpa [#allocation4], 0  ;;  %s30_s20 = sshll.u32 %s389_s1, 4  ;;  %s322_s21 = smov [#allocation5]   ;;  %s31_s20 = int_to_ptr.hbm [resolvable:$true] %s30_s20 }
   0x3   :  { %s32_s22 = sshll.u32 %s322_s21, 4  ;;  %s17_s25 = sshll.u32 %s388_s0, 4  ;;  %s33_s22 = int_to_ptr.vmem [resolvable:$true] %s32_s22  ;;  %s18_s25 = int_to_ptr.hbm [resolvable:$true] %s17_s25 }
   0x4   :  { %s323_s26 = smov 128   ;;  %s324_s27 = smov 8  }
   0x5   :  { %38 = dma.hbm_to_vmem [thread:$0]  %s31_s20, 2048, %s33_s22, [#allocation6], %s323_s26, %s323_s26, %s324_s27  }
   0x6   :  { %s325_s28 = smov [#allocation2]   ;;  %s45_s1 = sshll.u32 %s391_s3, 4  ;;  %s46_s1 = int_to_ptr.hbm [resolvable:$true] %s45_s1 }
   0x7   :  { %s19_s29 = sshll.u32 %s325_s28, 4  ;;  %s326_s0 = smov [#allocation7]   ;;  %s20_s29 = int_to_ptr.vmem [resolvable:$true] %s19_s29 }
   0x8   :  { %25 = dma.hbm_to_vmem [thread:$0]  %s18_s25, 256, %s20_s29, [#allocation3], %s323_s26, %s323_s26, %s324_s27  }
   0x9   :  { %s47_s7 = sshll.u32 %s326_s0, 4  ;;  %s48_s7 = int_to_ptr.vmem [resolvable:$true] %s47_s7 }
   0xa   :  { %53 = dma.hbm_to_vmem [thread:$0]  %s46_s1, 2048, %s48_s7, [#allocation6], %s323_s26, %s323_s26, %s324_s27  }
   0xb   :  { %316 = dma.done.wait [#allocation3], 256  }
   0xc   :  { %317 = vsyncadd [#allocation3], 4294967040 }
   0xd   :  { %318 = dma.done.wait [#allocation6], 4096  }
   0xe   :  { %319 = vsyncadd [#allocation6], 4294963200  ;;  %v85_v0 = vld [vmem:[#allocation5 + $0x78] sm:$0xff]  ;;  %v84_v1 = vld [vmem:[#allocation5 + $0x70] sm:$0xff]  ;;  %s327_s11 = smov [#allocation8]  }
   0xf   :  { %180 = vmatpush.msra.mxu2 %v85_v0  ;;  %90 = vmatpush.msra.mxu0 %v85_v0  ;;  %v83_v2 = vld [vmem:[#allocation5 + $0x68] sm:$0xff]  ;;  %v82_v3 = vld [vmem:[#allocation5 + $0x60] sm:$0xff]  ;;  %v81_v4 = vld [vmem:[#allocation5 + $0x58] sm:$0xff]  ;;  %s164_s12 = sshll.u32 %s327_s11, 4  ;;  %s165_s12 = int_to_ptr.vmem [resolvable:$true] %s164_s12 }
  0x10   :  { %v130_v5 = vld [vmem:[#allocation7 + $0x78] sm:$0xff]  ;;  %v129_v6 = vld [vmem:[#allocation7 + $0x70] sm:$0xff]  ;;  %v128_v8 = vld [vmem:[#allocation7 + $0x68] sm:$0xff] }
  0x11   :  { %181 = vmatpush.msra.mxu2 %v84_v1  ;;  %91 = vmatpush.msra.mxu0 %v84_v1  ;;  %v80_v7 = vld [vmem:[#allocation5 + $0x50] sm:$0xff]  ;;  %v79_v9 = vld [vmem:[#allocation5 + $0x48] sm:$0xff]  ;;  %v127_v10 = vld [vmem:[#allocation7 + $0x60] sm:$0xff] }
  0x12   :  { %196 = vmatpush.msra.mxu3 %v130_v5  ;;  %135 = vmatpush.msra.mxu1 %v130_v5  ;;  %v78_v11 = vld [vmem:[#allocation5 + $0x40] sm:$0xff]  ;;  %v126_v12 = vld [vmem:[#allocation7 + $0x58] sm:$0xff]  ;;  %v125_v14 = vld [vmem:[#allocation7 + $0x50] sm:$0xff] }
  0x13   :  { %182 = vmatpush.msra.mxu2 %v83_v2  ;;  %92 = vmatpush.msra.mxu0 %v83_v2  ;;  %v77_v13 = vld [vmem:[#allocation5 + $0x38] sm:$0xff]  ;;  %v76_v15 = vld [vmem:[#allocation5 + $0x30] sm:$0xff]  ;;  %v124_v16 = vld [vmem:[#allocation7 + $0x48] sm:$0xff] }
  0x14   :  { %197 = vmatpush.msra.mxu3 %v129_v6  ;;  %136 = vmatpush.msra.mxu1 %v129_v6  ;;  %v75_v17 = vld [vmem:[#allocation5 + $0x28] sm:$0xff]  ;;  %v123_v18 = vld [vmem:[#allocation7 + $0x40] sm:$0xff]  ;;  %v122_v20 = vld [vmem:[#allocation7 + $0x38] sm:$0xff] }
  0x15   :  { %183 = vmatpush.msra.mxu2 %v82_v3  ;;  %93 = vmatpush.msra.mxu0 %v82_v3  ;;  %v74_v19 = vld [vmem:[#allocation5 + $0x20] sm:$0xff]  ;;  %v73_v21 = vld [vmem:[#allocation5 + $0x18] sm:$0xff]  ;;  %v121_v22 = vld [vmem:[#allocation7 + $0x30] sm:$0xff] }
  0x16   :  { %198 = vmatpush.msra.mxu3 %v128_v8  ;;  %137 = vmatpush.msra.mxu1 %v128_v8  ;;  %v72_v23 = vld [vmem:[#allocation5 + $0x10] sm:$0xff]  ;;  %v120_v24 = vld [vmem:[#allocation7 + $0x28] sm:$0xff]  ;;  %v119_v26 = vld [vmem:[#allocation7 + $0x20] sm:$0xff] }
  0x17   :  { %184 = vmatpush.msra.mxu2 %v81_v4  ;;  %94 = vmatpush.msra.mxu0 %v81_v4  ;;  %v71_v25 = vld [vmem:[#allocation5 + $0x8] sm:$0xff]  ;;  %v70_v27 = vld [vmem:[#allocation5] sm:$0xff]  ;;  %v69_v28 = vld [vmem:[#allocation2 + $0x8] sm:$0xff] }
  0x18   :  { %199 = vmatpush.msra.mxu3 %v127_v10  ;;  %138 = vmatpush.msra.mxu1 %v127_v10  ;;  %v68_v29 = vld [vmem:[#allocation2] sm:$0xff]  ;;  %v118_v30 = vld [vmem:[#allocation7 + $0x18] sm:$0xff]  ;;  %v116_v32 = vld [vmem:[#allocation7 + $0x8] sm:$0xff] }
  0x19   :  { %185 = vmatpush.msra.mxu2 %v80_v7  ;;  %95 = vmatpush.msra.mxu0 %v80_v7  ;;  %v117_v31 = vld [vmem:[#allocation7 + $0x10] sm:$0xff]  ;;  %v115_v33 = vld [vmem:[#allocation7] sm:$0xff] }
  0x1a   :  { %200 = vmatpush.msra.mxu3 %v126_v12  ;;  %139 = vmatpush.msra.mxu1 %v126_v12  ;;  %v218_v34 = vld [vmem:[%s390_s2] ss:$0 sm:$0xff]  ;;  %s166_s2 = sshll.u32 %s393_s5, 4  ;;  %s167_s2 = int_to_ptr.hbm [resolvable:$true] %s166_s2 }
  0x1b   :  { %186 = vmatpush.msra.mxu2 %v79_v9  ;;  %96 = vmatpush.msra.mxu0 %v79_v9  ;;  %v219_v41 = vld [vmem:[%s392_s4] ss:$0 sm:$0xff] }
  0x1c   :  { %201 = vmatpush.msra.mxu3 %v125_v14  ;;  %140 = vmatpush.msra.mxu1 %v125_v14 }
  0x1d   :  { %187 = vmatpush.msra.mxu2 %v78_v11  ;;  %97 = vmatpush.msra.mxu0 %v78_v11 }
  0x1e   :  { %202 = vmatpush.msra.mxu3 %v124_v16  ;;  %141 = vmatpush.msra.mxu1 %v124_v16 }
  0x1f   :  { %188 = vmatpush.msra.mxu2 %v77_v13  ;;  %98 = vmatpush.msra.mxu0 %v77_v13 }
  0x20   :  { %203 = vmatpush.msra.mxu3 %v123_v18  ;;  %142 = vmatpush.msra.mxu1 %v123_v18 }
  0x21   :  { %189 = vmatpush.msra.mxu2 %v76_v15  ;;  %99 = vmatpush.msra.mxu0 %v76_v15 }
  0x22   :  { %204 = vmatpush.msra.mxu3 %v122_v20  ;;  %143 = vmatpush.msra.mxu1 %v122_v20 }
  0x23   :  { %190 = vmatpush.msra.mxu2 %v75_v17  ;;  %100 = vmatpush.msra.mxu0 %v75_v17 }
  0x24   :  { %205 = vmatpush.msra.mxu3 %v121_v22  ;;  %144 = vmatpush.msra.mxu1 %v121_v22 }
  0x25   :  { %191 = vmatpush.msra.mxu2 %v74_v19  ;;  %101 = vmatpush.msra.mxu0 %v74_v19 }
  0x26   :  { %206 = vmatpush.msra.mxu3 %v120_v24  ;;  %145 = vmatpush.msra.mxu1 %v120_v24 }
  0x27   :  { %192 = vmatpush.msra.mxu2 %v73_v21  ;;  %102 = vmatpush.msra.mxu0 %v73_v21 }
  0x28   :  { %207 = vmatpush.msra.mxu3 %v119_v26  ;;  %146 = vmatpush.msra.mxu1 %v119_v26 }
  0x29   :  { %193 = vmatpush.msra.mxu2 %v72_v23  ;;  %103 = vmatpush.msra.mxu0 %v72_v23 }
  0x2a   :  { %208 = vmatpush.msra.mxu3 %v118_v30  ;;  %147 = vmatpush.msra.mxu1 %v118_v30 }
  0x2b   :  { %194 = vmatpush.msra.mxu2 %v71_v25  ;;  %104 = vmatpush.msra.mxu0 %v71_v25 }
  0x2c   :  { %209 = vmatpush.msra.mxu3 %v117_v31  ;;  %148 = vmatpush.msra.mxu1 %v117_v31 }
  0x2d   :  { %195 = vmatpush.msra.mxu2 %v70_v27  ;;  %105 = vmatpush.msra.mxu0 %v70_v27 }
  0x2e   :  { %109 = vmatmul.f32.vlgmr.msra.gmra.mxu2 %v69_v28  ;;  %106 = vmatmul.f32.vlgmr.msra.gmra.mxu0 %v68_v29 }
  0x2f   :  { %210 = vmatpush.msra.mxu3 %v116_v32  ;;  %149 = vmatpush.msra.mxu1 %v116_v32 }
  0x31   :  { %211 = vmatpush.msra.mxu3 %v115_v33  ;;  %150 = vmatpush.msra.mxu1 %v115_v33 }
  0xab   :  { %v107_v35 = vpop.f32.mrf.mxu0 }
  0xac   :  { %v108_v36 = vadd.f32 %v218_v34, %v107_v35 }
  0xae   :  { %v113_v37 = vmax.f32 %v108_v36, 0.0 }
  0xb0   :  { %151 = vmatmul.f32.vlgmr.msra.gmra.mxu1 %v113_v37 }
  0xb1   :  { %v110_v38 = vpop.f32.mrf.mxu2 }
  0xb2   :  { %v111_v39 = vadd.f32 %v218_v34, %v110_v38 }
  0xb4   :  { %v114_v40 = vmax.f32 %v111_v39, 0.0 }
  0xb6   :  { %154 = vmatmul.f32.vlgmr.msra.gmra.mxu3 %v114_v40 }
 0x12d   :  { %v152_v42 = vpop.f32.mrf.mxu1 }
 0x12e   :  { %v153_v43 = vadd.f32 %v219_v41, %v152_v42 }
 0x130   :  { %158 = vst [vmem:[#allocation8] sm:$0xff] %v153_v43 }
 0x139   :  { %v155_v44 = vpop.f32.mrf.mxu3 }
 0x13a   :  { %v156_v45 = vadd.f32 %v219_v41, %v155_v44 }
 0x13c   :  { %159 = vst [vmem:[#allocation8 + $0x8] sm:$0xff] %v156_v45 }
 0x13d   :  { %172 = dma.vmem_to_hbm [thread:$0]  %s165_s12, 256, %s167_s2, [#allocation4], %s323_s26, %s323_s26, %s324_s27  }
 0x13e   :  { %320 = dma.done.wait [#allocation4], 256  }
 0x13f   :  { %321 = vsyncadd [#allocation4], 4294967040 }
 0x140   :  { %177 = vsyncpa [#allocation3], 1 }
 0x141   :  { %178 = vsyncpa [#allocation6], 1 }
 0x142   :  { %179 = vsyncpa [#allocation4], 1 }

</bundles_post_ra>
